<compile_context>
chip_gen: v6e
topology: v6e:2x2x1
jax: 0.10.0
libtpu: 0.0.40
codegen_flags: <defaults>
</compile_context>

<pallas_src>
import jax
import jax.numpy as jnp
from jax.experimental import pallas as pl
from jax.experimental.pallas import tpu as pltpu

# ----------------- config mirroring Gun.__init__ (scaled down) -----------------
HIDDEN = 16                      # LSTM hidden (200 in the reference)
OUTPUT_SIZE = 2 * HIDDEN         # bilstm -> self.output_size (400 in the reference)
N_CLASS = 3                      # len(get_class_mapping(super_mode='before'))
LOSS_WEIGHTS = (0.2, 0.4)        # -> weight_tensor = [0.2, 0.4, 0.4] (static config buffer)
CLASS_W = (float(LOSS_WEIGHTS[0]), float(LOSS_WEIGHTS[1]),
           float(1.0 - LOSS_WEIGHTS[0] - LOSS_WEIGHTS[1]))
MIN_H = 8                        # self.min_height
MIN_W = 8                        # self.min_width
# segment_choices = ['ele', 'dot', 'cos', 'linear'] -> D + 1 + 1 + 1 channels
ATTN_CHANNEL = OUTPUT_SIZE + 3
# Batches per grid step.  At reference scale (D=400, H=W~128) size this so
# 2 * BB * ((H+W)*D + H*W) * 4 bytes fits scoped VMEM (~16 on v7x, ~32-48 on
# v5e/v6e) and keep >=2 grid steps with "parallel" semantics for v7x's 2 TCs.
MAX_BATCH_CHUNK = 8


# ======================== fused per-chunk forward kernel ========================
def _gun_fused_kernel(ctx_ref, cur_ref, tgt_ref, wmul_ref, wadd_ref, w2_ref,
                      lane_ref, out_ref):
    ctx = ctx_ref[...]                       # (BB, H, D) f32
    cur = cur_ref[...]                       # (BB, W, D) f32
    tgt = tgt_ref[...]                       # (BB, H, W) int32
    BB, H, D = ctx.shape
    W = cur.shape[1]
    C = wmul_ref.shape[0]                    # = 3 (CE below is specialized for 3 classes)

    # inverse norms, allennlp eps placement x/(||x||+tiny); EUP approx reciprocal
    tiny = 1e-13
    inv_nc = pl.reciprocal(
        jnp.sqrt(jnp.sum(ctx * ctx, axis=-1, keepdims=True)) + tiny, approx=True)  # (BB,H,1)
    inv_nq = pl.reciprocal(
        jnp.sqrt(jnp.sum(cur * cur, axis=-1, keepdims=True)) + tiny, approx=True)  # (BB,W,1)

    # --- packed RHS: per-class (ele+dot+lin-col) rows + cur-normalized rows for cos ---
    wmul = wmul_ref[...]                     # (C, D): w_ele[:, c] + w_dot[c]
    wadd = wadd_ref[...]                     # (C, D): w_lin[c] * lin_w1
    rhs = jnp.concatenate(
        [cur * wmul[c] + wadd[c] for c in range(C)] + [cur * inv_nq],
        axis=1)                              # (BB, (C+1)*W, D)

    # --- ONE batched MXU contraction for all classes + cos ---
    dn = (((2,), (2,)), ((0,), (0,)))
    s = jax.lax.dot_general(ctx, rhs, dn,
                            preferred_element_type=jnp.float32)     # (BB, H, (C+1)*W)

    base = s[..., :C * W]                    # (BB, H, C*W): ele+dot + w_lin*lin_col, class-packed
    cosmat = inv_nc * s[..., C * W:]         # (BB, H, W)  : full cosine similarity

    # --- lin row term (cur·w2), produced lane-major directly via a 1-row dot ---
    w2b = jnp.broadcast_to(w2_ref[...], (BB, 1, D))
    lrow = jax.lax.dot_general(w2b, cur, dn,
                               preferred_element_type=jnp.float32)  # (BB, 1, W)

    # --- apply per-class head params as lane-packed vectors (no SMEM scalar splats) ---
    lane = lane_ref[...]                     # (3, C*W)
    wcos_l = lane[0:1, :]                    # w_cos[c] tiled over each W-block
    wlin_l = lane[1:2, :]                    # w_lin[c] tiled
    bconst_l = lane[2:3, :]                  # seg_b[c] + w_lin[c]*lin_b tiled

    cos_t = jnp.concatenate([cosmat] * C, axis=-1)                  # (BB, H, C*W)
    lin_t = jnp.concatenate([lrow] * C, axis=-1)                    # (BB, 1, C*W)
    logits = base + cos_t * wcos_l + lin_t * wlin_l + bconst_l      # (BB, H, C*W)

    # --- weighted cross-entropy, ignore_index = -1, over the whole chunk ---
    l0 = logits[..., 0 * W:1 * W]
    l1 = logits[..., 1 * W:2 * W]
    l2 = logits[..., 2 * W:3 * W]
    m = jnp.maximum(jnp.maximum(l0, l1), l2)
    lse = m + jnp.log(jnp.exp(l0 - m) + jnp.exp(l1 - m) + jnp.exp(l2 - m))
    picked = jnp.where(tgt == 0, l0, jnp.where(tgt == 1, l1, l2)) - lse
    picked = jnp.where(tgt >= 0, picked, 0.0)        # explicit ignore-index masking
    wt = jnp.where(tgt == 0, CLASS_W[0],
                   jnp.where(tgt == 1, CLASS_W[1],
                             jnp.where(tgt == 2, CLASS_W[2], 0.0)))

    num = jnp.sum(wt * picked, keepdims=True)        # (1, 1, 1)
    den = jnp.sum(wt, keepdims=True)                 # (1, 1, 1)
    out_ref[...] = jnp.concatenate([num, den], axis=-1)   # single (1, 1, 2) store


def _gun_fused(ctx, cur, tgt, wcomb, wadd, w2, lane_params, chunk):
    Bp, H, D = ctx.shape
    W = cur.shape[1]
    C = wcomb.shape[0]
    G = Bp // chunk
    return pl.pallas_call(
        _gun_fused_kernel,
        out_shape=jax.ShapeDtypeStruct((G, 1, 2), jnp.float32),     # [num, den] per chunk
        grid=(G,),
        in_specs=[
            pl.BlockSpec((chunk, H, D), lambda g: (g, 0, 0)),       # context_repr chunk
            pl.BlockSpec((chunk, W, D), lambda g: (g, 0, 0)),       # cur_repr chunk
            pl.BlockSpec((chunk, H, W), lambda g: (g, 0, 0)),       # matrix_map (targets) chunk
            pl.BlockSpec((C, D), lambda g: (0, 0)),                 # w_ele + w_dot     (C, D)
            pl.BlockSpec((C, D), lambda g: (0, 0)),                 # w_lin[c] * lin_w1 (C, D)
            pl.BlockSpec((1, D), lambda g: (0, 0)),                 # lin_w2            (1, D)
            pl.BlockSpec((3, C * W), lambda g: (0, 0)),             # lane-packed head params
        ],
        out_specs=pl.BlockSpec((1, 1, 2), lambda g: (g, 0, 0)),
        compiler_params=pltpu.CompilerParams(
            dimension_semantics=("parallel",)),
    )(ctx, cur, tgt, wcomb, wadd, w2, lane_params)


# ================================= wrapper ====================================
def init_params(key):
    k1, k2, k3 = jax.random.split(key, 3)
    return {
        # LinearMatrixAttention weight (split over the two inputs) + bias
        "lin_w1": 0.02 * jax.random.normal(k1, (1, OUTPUT_SIZE), jnp.float32),
        "lin_w2": 0.02 * jax.random.normal(k2, (1, OUTPUT_SIZE), jnp.float32),
        "lin_b": jnp.zeros((1, 1), jnp.float32),
        # segmentation head (1x1 conv): attn_channel -> n_class
        # rows: [ele (OUTPUT_SIZE), dot, cos, linear]  (matches segment_choices order)
        "seg_w": 0.05 * jax.random.normal(k3, (ATTN_CHANNEL, N_CLASS), jnp.float32),
        "seg_b": jnp.zeros((1, N_CLASS), jnp.float32),
        # NOTE: CrossEntropyLoss class weights come from static config (CLASS_W) and
        # are baked into the kernel as immediates, mirroring the torch buffer.
    }


def gun_forward(matrix_map, context_repr, cur_repr, params, *,
                max_batch_chunk=MAX_BATCH_CHUNK):
    B, _, D = context_repr.shape

    # pad representations up to min_height / min_width with zeros (plain-JAX glue)
    if context_repr.shape[1] < MIN_H:
        context_repr = jnp.pad(
            context_repr, ((0, 0), (0, MIN_H - context_repr.shape[1]), (0, 0)))
    if cur_repr.shape[1] < MIN_W:
        cur_repr = jnp.pad(
            cur_repr, ((0, 0), (0, MIN_W - cur_repr.shape[1]), (0, 0)))
    H, W = context_repr.shape[1], cur_repr.shape[1]

    # pad matrix_map with -1 if spatial sizes mismatch (plain-JAX glue)
    if matrix_map.shape[1] != H or matrix_map.shape[2] != W:
        padded = jnp.full((B, H, W), -1, dtype=matrix_map.dtype)
        padded = padded.at[:, :matrix_map.shape[1], :matrix_map.shape[2]].set(matrix_map)
        matrix_map = padded

    # --- batch chunking: BB batches per grid step; pad dummy batches with tgt=-1 ---
    BB = min(B, max_batch_chunk)
    G = -(-B // BB)
    Bp = G * BB
    if Bp != B:
        pad = Bp - B
        context_repr = jnp.pad(context_repr, ((0, pad), (0, 0), (0, 0)))
        cur_repr = jnp.pad(cur_repr, ((0, pad), (0, 0), (0, 0)))
        matrix_map = jnp.pad(matrix_map, ((0, pad), (0, 0), (0, 0)), constant_values=-1)

    # --- fold 1x1-conv head + LinearMatrixAttention params (tiny, host-side XLA) ---
    # channel order must stay in sync with segment_choices = ele, dot, cos, linear
    seg_w = params["seg_w"]                                   # (D + 3, n_class)
    seg_b = params["seg_b"].reshape(-1)                       # (n_class,)
    w_dot = seg_w[D, :]                                       # (n_class,)
    w_cos = seg_w[D + 1, :]                                   # (n_class,)
    w_lin = seg_w[D + 2, :]                                   # (n_class,)
    lin_b = params["lin_b"].reshape(())
    wcomb = (seg_w[:D, :] + w_dot[None, :]).T                 # (n_class, D): ele + dot fold
    wadd = w_lin[:, None] * params["lin_w1"]                  # (n_class, D): lin-col fold
    bconst = seg_b + w_lin * lin_b                            # (n_class,)
    lane_params = jnp.stack([jnp.repeat(w_cos, W),
                             jnp.repeat(w_lin, W),
                             jnp.repeat(bconst, W)], axis=0).astype(jnp.float32)  # (3, n_class*W)

    num_den = _gun_fused(context_repr, cur_repr, matrix_map.astype(jnp.int32),
                         wcomb, wadd, params["lin_w2"], lane_params, BB)
    num = jnp.sum(num_den[..., 0])
    den = jnp.sum(num_den[..., 1])
    # parity with torch CrossEntropyLoss: if every target is ignore_index (den == 0)
    # the result is NaN, same as the reference.
    loss = -num / den
    return {"loss": loss}


if __name__ == "__main__":
    key = jax.random.PRNGKey(0)
    kp, kc, kq, km = jax.random.split(key, 4)

    B, CTX_LEN, CUR_LEN = 2, 8, 8
    params = init_params(kp)

    # synthesized encoder outputs (stand-ins for BERT -> BiLSTM, eval-mode dropout)
    context_repr = jax.random.normal(kc, (B, CTX_LEN, OUTPUT_SIZE), jnp.float32)
    cur_repr = jax.random.normal(kq, (B, CUR_LEN, OUTPUT_SIZE), jnp.float32)
    # segmentation supervision map with some ignore_index=-1 cells
    matrix_map = jax.random.randint(km, (B, CTX_LEN, CUR_LEN), -1, N_CLASS).astype(jnp.int32)

    out = gun_forward(matrix_map, context_repr, cur_repr, params)
    jax.block_until_ready(out["loss"])
    assert out["loss"].shape == () and jnp.isfinite(out["loss"])
    print("KERNEL_OK")
</pallas_src>

<mosaic_0001>
module attributes {stable_mosaic.version = 11 : i64} {
  func.func @_gun_fused_kernel(%arg0: i32, %arg1: memref<2x8x32xf32, #tpu.memory_space<vmem>>, %arg2: memref<2x8x32xf32, #tpu.memory_space<vmem>>, %arg3: memref<2x8x8xi32, #tpu.memory_space<vmem>>, %arg4: memref<3x32xf32, #tpu.memory_space<vmem>>, %arg5: memref<3x32xf32, #tpu.memory_space<vmem>>, %arg6: memref<1x32xf32, #tpu.memory_space<vmem>>, %arg7: memref<3x24xf32, #tpu.memory_space<vmem>>, %arg8: memref<1x1x2xf32, #tpu.memory_space<vmem>>) attributes {dimension_semantics = [#tpu.dimension_semantics<parallel>], iteration_bounds = array<i64: 1>, scalar_prefetch = 0 : i64, scratch_operands = 0 : i64, tpu.core_type = #tpu.core_type<tc>, window_params = [{transform_indices = @transform_0, window_bounds = array<i64: 2, 8, 32>}, {transform_indices = @transform_1, window_bounds = array<i64: 2, 8, 32>}, {transform_indices = @transform_2, window_bounds = array<i64: 2, 8, 8>}, {pipeline_mode = #tpu.pipeline_mode<synchronous>, transform_indices = @transform_3, window_bounds = array<i64: 3, 32>}, {pipeline_mode = #tpu.pipeline_mode<synchronous>, transform_indices = @transform_4, window_bounds = array<i64: 3, 32>}, {pipeline_mode = #tpu.pipeline_mode<synchronous>, transform_indices = @transform_5, window_bounds = array<i64: 1, 32>}, {pipeline_mode = #tpu.pipeline_mode<synchronous>, transform_indices = @transform_6, window_bounds = array<i64: 3, 24>}, {transform_indices = @transform_7, window_bounds = array<i64: 1, 1, 2>}]} {
    %c0 = arith.constant 0 : index
    %c0_0 = arith.constant 0 : index
    %c0_1 = arith.constant 0 : index
    %0 = vector.load %arg1[%c0, %c0_0, %c0_1] : memref<2x8x32xf32, #tpu.memory_space<vmem>>, vector<2x8x32xf32>
    %c0_2 = arith.constant 0 : index
    %c0_3 = arith.constant 0 : index
    %c0_4 = arith.constant 0 : index
    %1 = vector.load %arg2[%c0_2, %c0_3, %c0_4] : memref<2x8x32xf32, #tpu.memory_space<vmem>>, vector<2x8x32xf32>
    %c0_5 = arith.constant 0 : index
    %c0_6 = arith.constant 0 : index
    %c0_7 = arith.constant 0 : index
    %2 = vector.load %arg3[%c0_5, %c0_6, %c0_7] : memref<2x8x8xi32, #tpu.memory_space<vmem>>, vector<2x8x8xi32>
    %3 = arith.mulf %0, %0 : vector<2x8x32xf32>
    %cst = arith.constant dense<0.000000e+00> : vector<2x8xf32>
    %4 = vector.multi_reduction <add>, %3, %cst [2] : vector<2x8x32xf32> to vector<2x8xf32>
    %5 = vector.shape_cast %4 : vector<2x8xf32> to vector<2x8x1xf32>
    %6 = math.sqrt %5 : vector<2x8x1xf32>
    %cst_8 = arith.constant 9.99999982E-14 : f32
    %7 = vector.broadcast %cst_8 : f32 to vector<2x8x1xf32>
    %8 = arith.addf %6, %7 : vector<2x8x1xf32>
    %9 = tpu.reciprocal %8 {approx = true} : vector<2x8x1xf32> -> vector<2x8x1xf32>
    %10 = arith.mulf %1, %1 : vector<2x8x32xf32>
    %cst_9 = arith.constant dense<0.000000e+00> : vector<2x8xf32>
    %11 = vector.multi_reduction <add>, %10, %cst_9 [2] : vector<2x8x32xf32> to vector<2x8xf32>
    %12 = vector.shape_cast %11 : vector<2x8xf32> to vector<2x8x1xf32>
    %13 = math.sqrt %12 : vector<2x8x1xf32>
    %cst_10 = arith.constant 9.99999982E-14 : f32
    %14 = vector.broadcast %cst_10 : f32 to vector<2x8x1xf32>
    %15 = arith.addf %13, %14 : vector<2x8x1xf32>
    %16 = tpu.reciprocal %15 {approx = true} : vector<2x8x1xf32> -> vector<2x8x1xf32>
    %c0_11 = arith.constant 0 : index
    %c0_12 = arith.constant 0 : index
    %17 = vector.load %arg4[%c0_11, %c0_12] : memref<3x32xf32, #tpu.memory_space<vmem>>, vector<3x32xf32>
    %c0_13 = arith.constant 0 : index
    %c0_14 = arith.constant 0 : index
    %18 = vector.load %arg5[%c0_13, %c0_14] : memref<3x32xf32, #tpu.memory_space<vmem>>, vector<3x32xf32>
    %19 = vector.extract_strided_slice %17 {offsets = [0, 0], sizes = [1, 32], strides = [1, 1]} : vector<3x32xf32> to vector<1x32xf32>
    %20 = vector.shape_cast %19 : vector<1x32xf32> to vector<32xf32>
    %21 = vector.shape_cast %20 : vector<32xf32> to vector<1x1x32xf32>
    %22 = vector.broadcast %21 : vector<1x1x32xf32> to vector<2x8x32xf32>
    %23 = arith.mulf %1, %22 : vector<2x8x32xf32>
    %24 = vector.extract_strided_slice %18 {offsets = [0, 0], sizes = [1, 32], strides = [1, 1]} : vector<3x32xf32> to vector<1x32xf32>
    %25 = vector.shape_cast %24 : vector<1x32xf32> to vector<32xf32>
    %26 = vector.shape_cast %25 : vector<32xf32> to vector<1x1x32xf32>
    %27 = vector.broadcast %26 : vector<1x1x32xf32> to vector<2x8x32xf32>
    %28 = arith.addf %23, %27 : vector<2x8x32xf32>
    %29 = vector.extract_strided_slice %17 {offsets = [1, 0], sizes = [1, 32], strides = [1, 1]} : vector<3x32xf32> to vector<1x32xf32>
    %30 = vector.shape_cast %29 : vector<1x32xf32> to vector<32xf32>
    %31 = vector.shape_cast %30 : vector<32xf32> to vector<1x1x32xf32>
    %32 = vector.broadcast %31 : vector<1x1x32xf32> to vector<2x8x32xf32>
    %33 = arith.mulf %1, %32 : vector<2x8x32xf32>
    %34 = vector.extract_strided_slice %18 {offsets = [1, 0], sizes = [1, 32], strides = [1, 1]} : vector<3x32xf32> to vector<1x32xf32>
    %35 = vector.shape_cast %34 : vector<1x32xf32> to vector<32xf32>
    %36 = vector.shape_cast %35 : vector<32xf32> to vector<1x1x32xf32>
    %37 = vector.broadcast %36 : vector<1x1x32xf32> to vector<2x8x32xf32>
    %38 = arith.addf %33, %37 : vector<2x8x32xf32>
    %39 = vector.extract_strided_slice %17 {offsets = [2, 0], sizes = [1, 32], strides = [1, 1]} : vector<3x32xf32> to vector<1x32xf32>
    %40 = vector.shape_cast %39 : vector<1x32xf32> to vector<32xf32>
    %41 = vector.shape_cast %40 : vector<32xf32> to vector<1x1x32xf32>
    %42 = vector.broadcast %41 : vector<1x1x32xf32> to vector<2x8x32xf32>
    %43 = arith.mulf %1, %42 : vector<2x8x32xf32>
    %44 = vector.extract_strided_slice %18 {offsets = [2, 0], sizes = [1, 32], strides = [1, 1]} : vector<3x32xf32> to vector<1x32xf32>
    %45 = vector.shape_cast %44 : vector<1x32xf32> to vector<32xf32>
    %46 = vector.shape_cast %45 : vector<32xf32> to vector<1x1x32xf32>
    %47 = vector.broadcast %46 : vector<1x1x32xf32> to vector<2x8x32xf32>
    %48 = arith.addf %43, %47 : vector<2x8x32xf32>
    %49 = vector.broadcast %16 : vector<2x8x1xf32> to vector<2x8x32xf32>
    %50 = arith.mulf %1, %49 : vector<2x8x32xf32>
    %51 = tpu.concatenate %28, %38, %48, %50 in 1 : vector<2x8x32xf32>, vector<2x8x32xf32>, vector<2x8x32xf32>, vector<2x8x32xf32> -> vector<2x32x32xf32>
    %cst_15 = arith.constant dense<0.000000e+00> : vector<2x8x32xf32>
    %52 = tpu.matmul %0, %51, %cst_15 {dimension_numbers = #tpu.dot_dimension_numbers<[2], [2], [1], [1], [0, 0, 0, 1, 1, 1], [0], [0]>} : vector<2x8x32xf32>, vector<2x32x32xf32>, vector<2x8x32xf32> -> vector<2x8x32xf32>
    %53 = vector.extract_strided_slice %52 {offsets = [0, 0, 0], sizes = [2, 8, 24], strides = [1, 1, 1]} : vector<2x8x32xf32> to vector<2x8x24xf32>
    %54 = vector.extract_strided_slice %52 {offsets = [0, 0, 24], sizes = [2, 8, 8], strides = [1, 1, 1]} : vector<2x8x32xf32> to vector<2x8x8xf32>
    %55 = vector.broadcast %9 : vector<2x8x1xf32> to vector<2x8x8xf32>
    %56 = arith.mulf %55, %54 : vector<2x8x8xf32>
    %c0_16 = arith.constant 0 : index
    %c0_17 = arith.constant 0 : index
    %57 = vector.load %arg6[%c0_16, %c0_17] : memref<1x32xf32, #tpu.memory_space<vmem>>, vector<1x32xf32>
    %58 = vector.shape_cast %57 : vector<1x32xf32> to vector<1x1x32xf32>
    %59 = vector.broadcast %58 : vector<1x1x32xf32> to vector<2x1x32xf32>
    %cst_18 = arith.constant dense<0.000000e+00> : vector<2x1x8xf32>
    %60 = tpu.matmul %59, %1, %cst_18 {dimension_numbers = #tpu.dot_dimension_numbers<[2], [2], [1], [1], [0, 0, 0, 1, 1, 1], [0], [0]>} : vector<2x1x32xf32>, vector<2x8x32xf32>, vector<2x1x8xf32> -> vector<2x1x8xf32>
    %c0_19 = arith.constant 0 : index
    %c0_20 = arith.constant 0 : index
    %61 = vector.load %arg7[%c0_19, %c0_20] : memref<3x24xf32, #tpu.memory_space<vmem>>, vector<3x24xf32>
    %62 = vector.extract_strided_slice %61 {offsets = [0, 0], sizes = [1, 24], strides = [1, 1]} : vector<3x24xf32> to vector<1x24xf32>
    %63 = vector.extract_strided_slice %61 {offsets = [1, 0], sizes = [1, 24], strides = [1, 1]} : vector<3x24xf32> to vector<1x24xf32>
    %64 = vector.extract_strided_slice %61 {offsets = [2, 0], sizes = [1, 24], strides = [1, 1]} : vector<3x24xf32> to vector<1x24xf32>
    %65 = tpu.concatenate %56, %56, %56 in 2 : vector<2x8x8xf32>, vector<2x8x8xf32>, vector<2x8x8xf32> -> vector<2x8x24xf32>
    %66 = tpu.concatenate %60, %60, %60 in 2 : vector<2x1x8xf32>, vector<2x1x8xf32>, vector<2x1x8xf32> -> vector<2x1x24xf32>
    %67 = vector.shape_cast %62 : vector<1x24xf32> to vector<1x1x24xf32>
    %68 = vector.broadcast %67 : vector<1x1x24xf32> to vector<2x8x24xf32>
    %69 = arith.mulf %65, %68 : vector<2x8x24xf32>
    %70 = arith.addf %53, %69 : vector<2x8x24xf32>
    %71 = vector.shape_cast %63 : vector<1x24xf32> to vector<1x1x24xf32>
    %72 = vector.broadcast %71 : vector<1x1x24xf32> to vector<2x1x24xf32>
    %73 = arith.mulf %66, %72 : vector<2x1x24xf32>
    %74 = vector.broadcast %73 : vector<2x1x24xf32> to vector<2x8x24xf32>
    %75 = arith.addf %70, %74 : vector<2x8x24xf32>
    %76 = vector.shape_cast %64 : vector<1x24xf32> to vector<1x1x24xf32>
    %77 = vector.broadcast %76 : vector<1x1x24xf32> to vector<2x8x24xf32>
    %78 = arith.addf %75, %77 : vector<2x8x24xf32>
    %79 = vector.extract_strided_slice %78 {offsets = [0, 0, 0], sizes = [2, 8, 8], strides = [1, 1, 1]} : vector<2x8x24xf32> to vector<2x8x8xf32>
    %80 = vector.extract_strided_slice %78 {offsets = [0, 0, 8], sizes = [2, 8, 8], strides = [1, 1, 1]} : vector<2x8x24xf32> to vector<2x8x8xf32>
    %81 = vector.extract_strided_slice %78 {offsets = [0, 0, 16], sizes = [2, 8, 8], strides = [1, 1, 1]} : vector<2x8x24xf32> to vector<2x8x8xf32>
    %82 = arith.maximumf %79, %80 : vector<2x8x8xf32>
    %83 = arith.maximumf %82, %81 : vector<2x8x8xf32>
    %84 = arith.subf %79, %83 : vector<2x8x8xf32>
    %85 = math.exp %84 : vector<2x8x8xf32>
    %86 = arith.subf %80, %83 : vector<2x8x8xf32>
    %87 = math.exp %86 : vector<2x8x8xf32>
    %88 = arith.addf %85, %87 : vector<2x8x8xf32>
    %89 = arith.subf %81, %83 : vector<2x8x8xf32>
    %90 = math.exp %89 : vector<2x8x8xf32>
    %91 = arith.addf %88, %90 : vector<2x8x8xf32>
    %92 = math.log %91 : vector<2x8x8xf32>
    %93 = arith.addf %83, %92 : vector<2x8x8xf32>
    %c0_i32 = arith.constant 0 : i32
    %94 = vector.broadcast %c0_i32 : i32 to vector<2x8x8xi32>
    %95 = arith.cmpi eq, %2, %94 : vector<2x8x8xi32>
    %c1_i32 = arith.constant 1 : i32
    %96 = vector.broadcast %c1_i32 : i32 to vector<2x8x8xi32>
    %97 = arith.cmpi eq, %2, %96 : vector<2x8x8xi32>
    %98 = arith.select %97, %80, %81 : vector<2x8x8xi1>, vector<2x8x8xf32>
    %99 = arith.select %95, %79, %98 : vector<2x8x8xi1>, vector<2x8x8xf32>
    %100 = arith.subf %99, %93 : vector<2x8x8xf32>
    %c0_i32_21 = arith.constant 0 : i32
    %101 = vector.broadcast %c0_i32_21 : i32 to vector<2x8x8xi32>
    %102 = arith.cmpi sge, %2, %101 : vector<2x8x8xi32>
    %cst_22 = arith.constant 0.000000e+00 : f32
    %103 = vector.broadcast %cst_22 : f32 to vector<2x8x8xf32>
    %104 = arith.select %102, %100, %103 : vector<2x8x8xi1>, vector<2x8x8xf32>
    %c0_i32_23 = arith.constant 0 : i32
    %105 = vector.broadcast %c0_i32_23 : i32 to vector<2x8x8xi32>
    %106 = arith.cmpi eq, %2, %105 : vector<2x8x8xi32>
    %c1_i32_24 = arith.constant 1 : i32
    %107 = vector.broadcast %c1_i32_24 : i32 to vector<2x8x8xi32>
    %108 = arith.cmpi eq, %2, %107 : vector<2x8x8xi32>
    %c2_i32 = arith.constant 2 : i32
    %109 = vector.broadcast %c2_i32 : i32 to vector<2x8x8xi32>
    %110 = arith.cmpi eq, %2, %109 : vector<2x8x8xi32>
    %cst_25 = arith.constant 4.000000e-01 : f32
    %cst_26 = arith.constant 0.000000e+00 : f32
    %111 = vector.broadcast %cst_25 : f32 to vector<2x8x8xf32>
    %112 = vector.broadcast %cst_26 : f32 to vector<2x8x8xf32>
    %113 = arith.select %110, %111, %112 : vector<2x8x8xi1>, vector<2x8x8xf32>
    %cst_27 = arith.constant 4.000000e-01 : f32
    %114 = vector.broadcast %cst_27 : f32 to vector<2x8x8xf32>
    %115 = arith.select %108, %114, %113 : vector<2x8x8xi1>, vector<2x8x8xf32>
    %cst_28 = arith.constant 2.000000e-01 : f32
    %116 = vector.broadcast %cst_28 : f32 to vector<2x8x8xf32>
    %117 = arith.select %106, %116, %115 : vector<2x8x8xi1>, vector<2x8x8xf32>
    %118 = arith.mulf %117, %104 : vector<2x8x8xf32>
    %119 = vector.shape_cast %118 : vector<2x8x8xf32> to vector<1x2x8x8xf32>
    %cst_29 = arith.constant dense<0.000000e+00> : vector<1xf32>
    %120 = vector.multi_reduction <add>, %119, %cst_29 [1, 2, 3] : vector<1x2x8x8xf32> to vector<1xf32>
    %121 = vector.shape_cast %120 : vector<1xf32> to vector<1x1x1x1xf32>
    %122 = vector.extract %121[0, 0, 0, 0] : f32 from vector<1x1x1x1xf32>
    %123 = vector.broadcast %122 : f32 to vector<1x1x1xf32>
    %124 = vector.shape_cast %117 : vector<2x8x8xf32> to vector<1x2x8x8xf32>
    %cst_30 = arith.constant dense<0.000000e+00> : vector<1xf32>
    %125 = vector.multi_reduction <add>, %124, %cst_30 [1, 2, 3] : vector<1x2x8x8xf32> to vector<1xf32>
    %126 = vector.shape_cast %125 : vector<1xf32> to vector<1x1x1x1xf32>
    %127 = vector.extract %126[0, 0, 0, 0] : f32 from vector<1x1x1x1xf32>
    %128 = vector.broadcast %127 : f32 to vector<1x1x1xf32>
    %129 = tpu.concatenate %123, %128 in 2 : vector<1x1x1xf32>, vector<1x1x1xf32> -> vector<1x1x2xf32>
    %c0_31 = arith.constant 0 : index
    %c0_32 = arith.constant 0 : index
    %c0_33 = arith.constant 0 : index
    %130 = vector.load %arg8[%c0_31, %c0_32, %c0_33] : memref<1x1x2xf32, #tpu.memory_space<vmem>>, vector<1x1x2xf32>
    tpu.vector_store %arg8[%c0_31, %c0_32, %c0_33], %129 {strides = array<i32>} : memref<1x1x2xf32, #tpu.memory_space<vmem>>, vector<1x1x2xf32>,
    return
  }
  func.func @transform_0(%arg0: i32) -> (i32, i32, i32) {
    %c0_i32 = arith.constant 0 : i32
    %c0_i32_0 = arith.constant 0 : i32
    %c0_i32_1 = arith.constant 0 : i32
    return %arg0, %c0_i32, %c0_i32_0 : i32, i32, i32
  }
  func.func @transform_1(%arg0: i32) -> (i32, i32, i32) {
    %c0_i32 = arith.constant 0 : i32
    %c0_i32_0 = arith.constant 0 : i32
    %c0_i32_1 = arith.constant 0 : i32
    return %arg0, %c0_i32, %c0_i32_0 : i32, i32, i32
  }
  func.func @transform_2(%arg0: i32) -> (i32, i32, i32) {
    %c0_i32 = arith.constant 0 : i32
    %c0_i32_0 = arith.constant 0 : i32
    %c0_i32_1 = arith.constant 0 : i32
    return %arg0, %c0_i32, %c0_i32_0 : i32, i32, i32
  }
  func.func @transform_3(%arg0: i32) -> (i32, i32) {
    %c0_i32 = arith.constant 0 : i32
    %c0_i32_0 = arith.constant 0 : i32
    %c0_i32_1 = arith.constant 0 : i32
    return %c0_i32, %c0_i32_0 : i32, i32
  }
  func.func @transform_4(%arg0: i32) -> (i32, i32) {
    %c0_i32 = arith.constant 0 : i32
    %c0_i32_0 = arith.constant 0 : i32
    %c0_i32_1 = arith.constant 0 : i32
    return %c0_i32, %c0_i32_0 : i32, i32
  }
  func.func @transform_5(%arg0: i32) -> (i32, i32) {
    %c0_i32 = arith.constant 0 : i32
    %c0_i32_0 = arith.constant 0 : i32
    %c0_i32_1 = arith.constant 0 : i32
    return %c0_i32, %c0_i32_0 : i32, i32
  }
  func.func @transform_6(%arg0: i32) -> (i32, i32) {
    %c0_i32 = arith.constant 0 : i32
    %c0_i32_0 = arith.constant 0 : i32
    %c0_i32_1 = arith.constant 0 : i32
    return %c0_i32, %c0_i32_0 : i32, i32
  }
  func.func @transform_7(%arg0: i32) -> (i32, i32, i32) {
    %c0_i32 = arith.constant 0 : i32
    %c0_i32_0 = arith.constant 0 : i32
    %c0_i32_1 = arith.constant 0 : i32
    return %arg0, %c0_i32, %c0_i32_0 : i32, i32, i32
  }
}

</mosaic_0001>

<bundles_post_ra>
// kernel: tpu_custom_call.1
= control target key start
LH: loop header
LB: loop body
LE: loop exit
PB: predicated region body
PF: predicated region fallthrough
CT: control target
= control target key end

     0   :  { %12 = vsyncpa [#allocation3], 0  ;;  %s1183_s0 = inlined_call_operand.hbm [shape: f32[2,8,32], index: 0, kind: input, shape index: {}]   ;;  %s1184_s1 = inlined_call_operand.hbm [shape: f32[2,8,32], index: 1, kind: input, shape index: {}]   ;;  %s1185_s2 = inlined_call_operand.hbm [shape: s32[2,8,8], index: 2, kind: input, shape index: {}]   ;;  %s1186_s3 = inlined_call_operand.vmem [shape: f32[3,32], index: 3, kind: input, shape index: {}]   ;;  %s1187_s4 = inlined_call_operand.hbm [shape: f32[3,32], index: 4, kind: input, shape index: {}]   ;;  %s1188_s5 = inlined_call_operand.vmem [shape: f32[1,32], index: 5, kind: input, shape index: {}]   ;;  %s1189_s6 = inlined_call_operand.vmem [shape: f32[3,24], index: 6, kind: input, shape index: {}]   ;;  %s1190_s7 = inlined_call_operand.hbm [shape: f32[1,1,2], index: 7, kind: output, shape index: {}]  }
   0x1   :  { %13 = vsyncpa [#allocation6], 0 }
   0x2   :  { %14 = vsyncpa [#allocation9], 0 }
   0x3   :  { %15 = vsyncpa [#allocation4], 0  ;;  %s939_s24 = smov [#allocation5]   ;;  %s940_s26 = smov [#allocation2]  }
   0x4   :  { %s33_s25 = sshll.u32 %s939_s24, 4  ;;  %s21_s27 = sshll.u32 %s940_s26, 4  ;;  %s34_s25 = int_to_ptr.vmem [resolvable:$true] %s33_s25  ;;  %s22_s27 = int_to_ptr.vmem [resolvable:$true] %s21_s27 }
   0x5   :  { %s839_s28 = scalar_lea.vmem %s34_s25, 256  ;;  %p844_p1 = scmp.lt.s32.totalorder %s34_s25, %s34_s25 }
   0x6   :  { %p840_p0 = scmp.ne.s32.totalorder %s34_s25, %s839_s28  ;;  %p845_p2 = scmp.lt.s32.totalorder %s839_s28, %s839_s28 }
   0x8   :  { %p846_p3 = por %p845_p2, %p844_p1 }
   0xa   :  { %p847_p4 = pnand %p846_p3, %p840_p0 }
   0xc   :  { %850 = shalt.err (!%p847_p4)
}
   0xd   :  { %s941_s29 = smov 128   ;;  %s942_s30 = smov 8  }
   0xe   :  { %39 = dma.hbm_to_vmem [thread:$0]  %s1184_s1, 256, %s34_s25, [#allocation6], %s941_s29, %s941_s29, %s942_s30  }
   0xf   :  { %s859_s10 = scalar_lea.vmem %s22_s27, 256  ;;  %p864_p6 = scmp.lt.s32.totalorder %s22_s27, %s22_s27 }
  0x10   :  { %p860_p5 = scmp.ne.s32.totalorder %s22_s27, %s859_s10  ;;  %p865_p7 = scmp.lt.s32.totalorder %s859_s10, %s859_s10 }
  0x12   :  { %p866_p8 = por %p865_p7, %p864_p6 }
  0x14   :  { %p867_p9 = pnand %p866_p8, %p860_p5 }
  0x16   :  { %870 = shalt.err (!%p867_p9)
}
  0x17   :  { %27 = dma.hbm_to_vmem [thread:$0]  %s1183_s0, 256, %s22_s27, [#allocation3], %s941_s29, %s941_s29, %s942_s30  }
  0x18   :  { %s943_s13 = smov [#allocation7]   ;;  %s944_s15 = smov [#allocation8]  }
  0x19   :  { %s45_s14 = sshll.u32 %s943_s13, 4  ;;  %s60_s16 = sshll.u32 %s944_s15, 4  ;;  %s46_s14 = int_to_ptr.vmem [resolvable:$true] %s45_s14  ;;  %s61_s16 = int_to_ptr.vmem [resolvable:$true] %s60_s16 }
  0x1a   :  { %s879_s17 = scalar_lea.vmem %s46_s14, 256  ;;  %p884_p11 = scmp.lt.s32.totalorder %s46_s14, %s46_s14 }
  0x1b   :  { %p880_p10 = scmp.ne.s32.totalorder %s46_s14, %s879_s17  ;;  %p885_p12 = scmp.lt.s32.totalorder %s879_s17, %s879_s17 }
  0x1d   :  { %p886_p13 = por %p885_p12, %p884_p11 }
  0x1f   :  { %p887_p0 = pnand %p886_p13, %p880_p10 }
  0x21   :  { %890 = shalt.err (!%p887_p0)
}
  0x22   :  { %51 = dma.hbm_to_vmem [thread:$0]  %s1185_s2, 256, %s46_s14, [#allocation6], %s941_s29, %s941_s29, %s942_s30  }
  0x23   :  { %s899_s19 = scalar_lea.vmem %s61_s16, 64  ;;  %p904_p2 = scmp.lt.s32.totalorder %s61_s16, %s61_s16 }
  0x24   :  { %p900_p1 = scmp.ne.s32.totalorder %s61_s16, %s899_s19  ;;  %p905_p3 = scmp.lt.s32.totalorder %s899_s19, %s899_s19 }
  0x26   :  { %p906_p4 = por %p905_p3, %p904_p2 }
  0x28   :  { %p907_p5 = pnand %p906_p4, %p900_p1 }
  0x2a   :  { %910 = shalt.err (!%p907_p5)
}
  0x2b   :  { %63 = dma.hbm_to_vmem [thread:$0]  %s1187_s4, 64, %s61_s16, [#allocation9]  }
  0x2c   :  { %931 = dma.done.wait [#allocation3], 256  }
  0x2d   :  { %932 = vsyncadd [#allocation3], 4294967040 }
  0x2e   :  { %933 = dma.done.wait [#allocation6], 512  }
  0x2f   :  { %934 = vsyncadd [#allocation6], 4294966784 }
  0x30   :  { %935 = dma.done.wait [#allocation9], 64  }
  0x31   :  { %936 = vsyncadd [#allocation9], 4294967232  ;;  %v1007_v0 = vld [vmem:[#allocation5] sm:$0xff]  ;;  %vm88_vm0 = vcmask 261120   ;;  %v1009_v1 = vld [vmem:[#allocation5 + $0x8] sm:$0xff]  ;;  %v945_v6 = vmov 0.0   ;;  %v141_v19 = vlaneseq }
  0x32   :  { %v113_v2 = vmul.f32 %v1007_v0, %v1007_v0  ;;  %v114_v3 = vmul.f32 %v1009_v1, %v1009_v1  ;;  %750 = vmatprep.subr.mxu0 %v945_v6  ;;  %761 = vmatprep.subr.mxu1 %v945_v6  ;;  %vm946_vm1 = vmmov 0   ;;  %v1023_v7 = vld [vmem:[#allocation2] sm:$0xff]  ;;  %v1027_v9 = vld [vmem:[#allocation2 + $0x8] sm:$0xff]  ;;  %v140_v33 = vld [vmem:[#allocation8] sm:$0x7]  ;;  %s948_s22 = smov 120  }
  0x33   :  { %758 = vmatprep.mubr.msk.f32.mxu0 %vm946_vm1, %v945_v6  ;;  %769 = vmatprep.mubr.msk.f32.mxu1 %vm946_vm1, %v945_v6  ;;  %v86_v8 = vmul.f32 %v1023_v7, %v1023_v7  ;;  %v87_v11 = vmul.f32 %v1027_v9, %v1027_v9  ;;  %v142_v26 = vshrl.u32 %v141_v19, 7  ;;  %v139_v30 = vld [vmem:[%s1186_s3] sm:$0x7]  ;;  %s949_s23 = smov 112   ;;  %s950_s24 = smov 16   ;;  %vm522_vm10 = vcmask 64512  }
  0x34   :  { %v115_v4 = vsel %vm88_vm0, %v113_v2, 0.0  ;;  %v118_v5 = vsel %vm88_vm0, %v114_v3, 0.0  ;;  %v351_v56 = vld [vmem:[%s1188_s5] sm:$0x1]  ;;  %s947_s5 = smov 104   ;;  %vm525_vm11 = vcmask 130048  }
  0x35   :  { %116 = vadd.xlane.f32.xlu0 %v115_v4  ;;  %v89_v10 = vsel %vm88_vm0, %v86_v8, 0.0  ;;  %v92_v12 = vsel %vm88_vm0, %v87_v11, 0.0  ;;  %v1033_v29 = vsub.s32 2, %v142_v26  ;;  %v155_v31 = vsub.s32 1, %v142_v26 }
  0x36   :  { %90 = vadd.xlane.f32.xlu1 %v89_v10  ;;  %v1041_v37 = vsub.s32 0, %v142_v26 }
  0x37   :  { %v168_v32 = vrot.slane %v139_v30, %v1033_v29  ;;  %v156_v34 = vrot.slane %v139_v30, %v155_v31  ;;  %v174_v36 = vrot.slane %v140_v33, %v1033_v29  ;;  %v162_v41 = vrot.slane %v140_v33, %v155_v31 }
  0x38   :  { %v144_v44 = vrot.slane %v139_v30, %v1041_v37  ;;  %v150_v50 = vrot.slane %v140_v33, %v1041_v37 }
  0x39   :  { %119 = vadd.xlane.f32.xlu0 %v118_v5  ;;  %v169_v35 = vmul.f32 %v168_v32, %v1007_v0  ;;  %v157_v40 = vmul.f32 %v156_v34, %v1007_v0  ;;  %v170_v42 = vmul.f32 %v168_v32, %v1009_v1  ;;  %v158_v51 = vmul.f32 %v156_v34, %v1009_v1 }
  0x3a   :  { %93 = vadd.xlane.f32.xlu1 %v92_v12  ;;  %v145_v49 = vmul.f32 %v144_v44, %v1007_v0  ;;  %v146_v54 = vmul.f32 %v144_v44, %v1009_v1 }
  0x3b   :  { %v175_v43 = vadd.f32 %v174_v36, %v169_v35  ;;  %v163_v47 = vadd.f32 %v162_v41, %v157_v40  ;;  %v176_v48 = vadd.f32 %v174_v36, %v170_v42  ;;  %v164_v53 = vadd.f32 %v162_v41, %v158_v51 }
  0x3c   :  { %v151_v52 = vadd.f32 %v150_v50, %v145_v49  ;;  %v152_v55 = vadd.f32 %v150_v50, %v146_v54 }
  0xbe   :  { %v117_v13 = vpop.xlane.xlu0 %116 }
  0xbf   :  { %799 = vrsqrt.f32 %v117_v13  ;;  %vm123_vm2 = vcmp.eq.f32.partialorder %v117_v13, inf  ;;  %v126_v17 = vand.u32 2147483648, %v117_v13  ;;  %vm125_vm3 = vcmp.eq.f32.partialorder %v117_v13, 0.0  ;;  %v91_v57 = vpop.xlane.xlu1 %90 }
  0xc0   :  { %vm97_vm6 = vcmp.eq.f32.partialorder %v91_v57, inf  ;;  %v100_v62 = vand.u32 2147483648, %v91_v57  ;;  %vm99_vm7 = vcmp.eq.f32.partialorder %v91_v57, 0.0 }
  0xc2   :  { %v120_v14 = vpop.xlane.xlu0 %119 }
  0xc3   :  { %801 = vrsqrt.f32 %v120_v14  ;;  %vm130_vm4 = vcmp.eq.f32.partialorder %v120_v14, inf  ;;  %v133_v24 = vand.u32 2147483648, %v120_v14  ;;  %vm132_vm5 = vcmp.eq.f32.partialorder %v120_v14, 0.0  ;;  %v94_v58 = vpop.xlane.xlu1 %93 }
  0xc4   :  { %vm104_vm8 = vcmp.eq.f32.partialorder %v94_v58, inf  ;;  %vm106_vm9 = vcmp.eq.f32.partialorder %v94_v58, 0.0 }
  0xcc   :  { %v800_v15 = vpop.eup %799 }
  0xcd   :  { %v122_v16 = vmul.f32 %v800_v15, %v117_v13 }
  0xcf   :  { %v124_v18 = vsel %vm123_vm2, %v117_v13, %v122_v16 }
  0xd0   :  { %v802_v20 = vpop.eup %801  ;;  %v127_v21 = vsel %vm125_vm3, %v126_v17, %v124_v18 }
  0xd1   :  { %v135_v22 = vadd.f32 1e-13, %v127_v21  ;;  %v129_v23 = vmul.f32 %v802_v20, %v120_v14 }
  0xd3   :  { %803 = vrcp.f32 %v135_v22  ;;  %v131_v25 = vsel %vm130_vm4, %v120_v14, %v129_v23  ;;  %v501_v23 = vld [vmem:[%s1189_s6] sm:$0x7]  ;;  %s951_s6 = smov [#allocation10]   ;;  %vm701_vm4 = vcmask 7168  }
  0xd4   :  { %v134_v27 = vsel %vm132_vm5, %v133_v24, %v131_v25  ;;  %v549_v26 = vrot.slane %v501_v23, %v1041_v37  ;;  %v555_v30 = vrot.slane %v501_v23, 1  ;;  %s711_s27 = sshll.u32 %s951_s6, 4  ;;  %vm703_vm5 = vcmask 8192   ;;  %s712_s27 = int_to_ptr.vmem [resolvable:$true] %s711_s27 }
  0xd5   :  { %v136_v28 = vadd.f32 1e-13, %v134_v27  ;;  %s915_s8 = scalar_lea.vmem %s712_s27, 32  ;;  %p916_p7 = scmp.lt.s32.totalorder %s712_s27, %s712_s27 }
  0xd7   :  { %805 = vrcp.f32 %v136_v28 }
  0xd8   :  { %807 = vrsqrt.f32 %v91_v57 }
  0xd9   :  { %809 = vrsqrt.f32 %v94_v58 }
  0xe0   :  { %v804_v38 = vpop.eup %803 }
  0xe1   :  { %v177_v39 = vmul.f32 %v804_v38, %v1007_v0  ;;  %v572_v38 = vrot.slane %v501_v23, %v1033_v29 }
  0xe3   :  { %751 = vmatpush3.xpose.msk.msra.mxu0 %vm88_vm0, %v177_v39 }
  0xe4   :  { %v806_v45 = vpop.eup %805  ;;  %752 = vmatprep.subr.mxu0 %v945_v6 }
  0xe5   :  { %v178_v46 = vmul.f32 %v806_v45, %v1009_v1  ;;  %v808_v59 = vpop.eup %807 }
  0xe6   :  { %v96_v60 = vmul.f32 %v808_v59, %v91_v57  ;;  %v810_v61 = vpop.eup %809 }
  0xe7   :  { %753 = vmatpush3.xpose.msk.msra.mxu0 %vm88_vm0, %v175_v43  ;;  %762 = vmatpush3.xpose.msk.msra.mxu1 %vm88_vm0, %v178_v46 }
  0xe8   :  { %754 = vmatprep.subr.mxu0 %v945_v6  ;;  %763 = vmatprep.subr.mxu1 %v945_v6  ;;  %v98_v63 = vsel %vm97_vm6, %v91_v57, %v96_v60 }
  0xe9   :  { %v101_v2 = vsel %vm99_vm7, %v100_v62, %v98_v63 }
  0xea   :  { %v109_v4 = vadd.f32 1e-13, %v101_v2 }
  0xeb   :  { %755 = vmatpush3.xpose.msk.msra.mxu0 %vm88_vm0, %v163_v47  ;;  %764 = vmatpush3.xpose.msk.msra.mxu1 %vm88_vm0, %v176_v48 }
  0xec   :  { %756 = vmatprep.subr.mxu0 %v945_v6  ;;  %765 = vmatprep.subr.mxu1 %v945_v6  ;;  %811 = vrcp.f32 %v109_v4 }
  0xef   :  { %757 = vmatpush3.xpose.msk.msra.mxu0 %vm88_vm0, %v151_v52  ;;  %766 = vmatpush3.xpose.msk.msra.mxu1 %vm88_vm0, %v164_v53 }
  0xf0   :  { %767 = vmatprep.subr.mxu1 %v945_v6  ;;  %772 = vmatprep.subr.mxu0 %v945_v6 }
  0xf2   :  { %759 = vmatmul.mubr.msk.f32.vlgmr.msra.gmra.mxu0 %vm88_vm0, %v1023_v7 }
  0xf3   :  { %768 = vmatpush3.xpose.msk.msra.mxu1 %vm88_vm0, %v152_v55  ;;  %773 = vmatpush3.xpose.msk.msra.mxu0 %vm88_vm0, %v1007_v0  ;;  %v103_v0 = vmul.f32 %v810_v61, %v94_v58 }
  0xf4   :  { %774 = vmatprep.mubr.msk.f32.mxu0 %vm946_vm1, %v945_v6  ;;  %777 = vmatprep.subr.mxu1 %v945_v6 }
  0xf5   :  { %v105_v3 = vsel %vm104_vm8, %v94_v58, %v103_v0 }
  0xf6   :  { %770 = vmatmul.mubr.msk.f32.vlgmr.msra.gmra.mxu1 %vm88_vm0, %v1027_v9  ;;  %775 = vmatmul.mubr.msk.f32.vlgmr.msra.gmra.mxu0 %vm88_vm0, %v351_v56 }
  0xf7   :  { %778 = vmatpush3.xpose.msk.msra.mxu1 %vm88_vm0, %v1009_v1  ;;  %779 = vmatprep.mubr.msk.f32.mxu1 %vm946_vm1, %v945_v6  ;;  %v107_v1 = vand.u32 2147483648, %v94_v58 }
  0xf9   :  { %v108_v5 = vsel %vm106_vm9, %v107_v1, %v105_v3  ;;  %v812_v8 = vpop.eup %811 }
  0xfa   :  { %780 = vmatmul.mubr.msk.f32.vlgmr.msra.gmra.mxu1 %vm88_vm0, %v351_v56  ;;  %v110_v7 = vadd.f32 1e-13, %v108_v5 }
  0xfc   :  { %813 = vrcp.f32 %v110_v7 }
 0x109   :  { %v814_v12 = vpop.eup %813 }
 0x1b2   :  { %v260_v9 = vpop.f32.mrf.mxu0 }
 0x1b3   :  { %v349_v10 = vmul.f32 %v812_v8, %v260_v9 }
 0x1b4   :  { %v760_v11 = vpop.f32.mrf.mxu0 }
 0x1b5   :  { %504 = vrot.lane.b32.xlu0 %v349_v10, %s947_s5 }
 0x1b6   :  { %v345_v13 = vpop.f32.mrf.mxu1  ;;  %v424_v14 = vpop.f32.mrf.mxu0 }
 0x1b7   :  { %v350_v15 = vmul.f32 %v814_v12, %v345_v13 }
 0x1b8   :  { %v771_v16 = vpop.f32.mrf.mxu1  ;;  %v776_v17 = vpop.f32.mrf.mxu0 }
 0x1b9   :  { %516 = vrot.lane.b32.xlu0 %v349_v10, %s948_s22  ;;  %506 = vrot.lane.b32.xlu1 %v350_v15, %s947_s5  ;;  %v84_v16 = vld [vmem:[#allocation7] sm:$0xff] }
 0x1ba   :  { %v497_v18 = vpop.f32.mrf.mxu1  ;;  %vm665_vm13 = vcmp.eq.s32.totalorder %v84_v16, 2  ;;  %vm653_vm15 = vcmp.eq.s32.totalorder %v84_v16, 1  ;;  %vm651_vm1 = vcmp.eq.s32.totalorder %v84_v16, 0  ;;  %vm661_vm2 = vcmp.ge.s32.totalorder %v84_v16, 0 }
 0x1bc   :  { %v781_v19 = vpop.f32.mrf.mxu1 }
 0x1bd   :  { %530 = vrot.lane.b32.xlu0 %v424_v14, %s942_s30  ;;  %510 = vrot.lane.b32.xlu1 %v349_v10, %s949_s23 }
 0x1c1   :  { %536 = vrot.lane.b32.xlu0 %v424_v14, %s950_s24  ;;  %512 = vrot.lane.b32.xlu1 %v350_v15, %s949_s23 }
 0x1c5   :  { %518 = vrot.lane.b32.xlu1 %v350_v15, %s948_s22  ;;  %v85_v15 = vld [vmem:[#allocation7 + $0x8] sm:$0xff] }
 0x1c6   :  { %vm666_vm12 = vcmp.eq.s32.totalorder %v85_v15, 2  ;;  %vm654_vm14 = vcmp.eq.s32.totalorder %v85_v15, 1  ;;  %vm652_vm0 = vcmp.eq.s32.totalorder %v85_v15, 0  ;;  %vm662_vm3 = vcmp.ge.s32.totalorder %v85_v15, 0 }
 0x1c7   :  { %v668_v17 = vsel %vm666_vm12, 0.4, %v945_v6 }
 0x1c8   :  { %v670_v19 = vsel %vm654_vm14, 0.4, %v668_v17 }
 0x1c9   :  { %532 = vrot.lane.b32.xlu1 %v497_v18, %s942_s30 }
 0x1cd   :  { %538 = vrot.lane.b32.xlu1 %v497_v18, %s950_s24 }
 0x227   :  { %v505_v20 = vpop.permute.xlu0 %504 }
 0x22b   :  { %v517_v21 = vpop.permute.xlu0 %516  ;;  %v507_v22 = vpop.permute.xlu1 %506 }
 0x22f   :  { %v531_v24 = vpop.permute.xlu0 %530  ;;  %v511_v25 = vpop.permute.xlu1 %510 }
 0x230   :  { %v523_v27 = vsel %vm522_vm10, %v505_v20, %v511_v25  ;;  %v542_v31 = vsel %vm522_vm10, %v424_v14, %v531_v24 }
 0x231   :  { %v526_v28 = vsel %vm525_vm11, %v523_v27, %v517_v21  ;;  %v672_v21 = vsel %vm652_vm0, 0.2, %v670_v19 }
 0x232   :  { %v550_v34 = vmul.f32 %v549_v26, %v526_v28  ;;  %v689_v24 = vsel %vm522_vm10, %v672_v21, 0.0 }
 0x233   :  { %v537_v32 = vpop.permute.xlu0 %536  ;;  %v513_v33 = vpop.permute.xlu1 %512 }
 0x234   :  { %v544_v35 = vsel %vm525_vm11, %v542_v31, %v537_v32  ;;  %v552_v40 = vadd.f32 %v550_v34, %v260_v9  ;;  %v524_v43 = vsel %vm522_vm10, %v507_v22, %v513_v33 }
 0x235   :  { %v557_v36 = vmul.f32 %v555_v30, %v544_v35 }
 0x237   :  { %v562_v39 = vrot.slane %v557_v36, %v1041_v37  ;;  %v519_v41 = vpop.permute.xlu1 %518 }
 0x238   :  { %v527_v46 = vsel %vm525_vm11, %v524_v43, %v519_v41 }
 0x239   :  { %v567_v42 = vadd.f32 %v562_v39, %v552_v40  ;;  %v551_v47 = vmul.f32 %v549_v26, %v527_v46 }
 0x23b   :  { %v1104_v44 = vadd.f32 %v572_v38, %v567_v42  ;;  %v533_v45 = vpop.permute.xlu1 %532  ;;  %v553_v51 = vadd.f32 %v551_v47, %v345_v13 }
 0x23c   :  { %v543_v48 = vsel %vm522_vm10, %v497_v18, %v533_v45  ;;  %v667_v18 = vsel %vm665_vm13, 0.4, %v945_v6 }
 0x23d   :  { %577 = vrot.lane.b32.xlu0 %v1104_v44, %s948_s22  ;;  %v669_v20 = vsel %vm653_vm15, 0.4, %v667_v18 }
 0x23e   :  { %v671_v22 = vsel %vm651_vm1, 0.2, %v669_v20 }
 0x23f   :  { %v539_v49 = vpop.permute.xlu1 %538  ;;  %v688_v23 = vsel %vm522_vm10, %v671_v22, 0.0 }
 0x240   :  { %v545_v29 = vsel %vm525_vm11, %v543_v48, %v539_v49  ;;  %v690_v25 = vadd.f32 %v689_v24, %v688_v23 }
 0x241   :  { %v558_v50 = vmul.f32 %v555_v30, %v545_v29  ;;  %585 = vrot.lane.b32.xlu0 %v1104_v44, %s949_s23 }
 0x243   :  { %v566_v52 = vrot.slane %v558_v50, %v1041_v37 }
 0x245   :  { %v568_v53 = vadd.f32 %v566_v52, %v553_v51 }
 0x247   :  { %v1114_v54 = vadd.f32 %v572_v38, %v568_v53 }
 0x249   :  { %579 = vrot.lane.b32.xlu1 %v1114_v54, %s948_s22 }
 0x24d   :  { %587 = vrot.lane.b32.xlu1 %v1114_v54, %s949_s23 }
 0x2af   :  { %v1120_v55 = vpop.permute.xlu0 %577 }
 0x2b0   :  { %v583_v56 = vmax.f32 %v1104_v44, %v1120_v55 }
 0x2b3   :  { %v1124_v57 = vpop.permute.xlu0 %585 }
 0x2b4   :  { %v1127_v58 = vmax.f32 %v583_v56, %v1124_v57  ;;  %v655_v43 = vsel %vm653_vm15, %v1120_v55, %v1124_v57 }
 0x2b5   :  { %v657_v46 = vsel %vm651_vm1, %v1104_v44, %v655_v43 }
 0x2b6   :  { %601 = vrot.lane.b32.xlu0 %v1127_v58, %s942_s30  ;;  %v593_v6 = vsub.f32 %v1104_v44, %v1127_v58 }
 0x2b8   :  { %v595_v26 = vmul.f32 1.442695, %v593_v6 }
 0x2ba   :  { %623 = vrot.lane.b32.xlu0 %v1127_v58, %s950_s24 }
 0x2bb   :  { %v1133_v37 = vpop.permute.xlu1 %579 }
 0x2bc   :  { %v584_v59 = vmax.f32 %v1114_v54, %v1133_v37 }
 0x2bf   :  { %v1137_v60 = vpop.permute.xlu1 %587 }
 0x2c0   :  { %v1140_v61 = vmax.f32 %v584_v59, %v1137_v60  ;;  %v656_v49 = vsel %vm654_vm14, %v1133_v37, %v1137_v60 }
 0x2c1   :  { %v658_v52 = vsel %vm652_vm0, %v1114_v54, %v656_v49 }
 0x2c2   :  { %603 = vrot.lane.b32.xlu1 %v1140_v61, %s942_s30  ;;  %v594_v27 = vsub.f32 %v1114_v54, %v1140_v61  ;;  %s911_s30 = scalar_lea.vmem %s712_s27, 16 }
 0x2c3   :  { %p912_p6 = scmp.ne.s32.totalorder %s712_s27, %s911_s30  ;;  %p917_p8 = scmp.lt.s32.totalorder %s915_s8, %s911_s30 }
 0x2c4   :  { %v597_v28 = vmul.f32 1.442695, %v594_v27 }
 0x2c5   :  { %p918_p9 = por %p917_p8, %p916_p7 }
 0x2c6   :  { %625 = vrot.lane.b32.xlu1 %v1140_v61, %s950_s24 }
 0x2c7   :  { %p919_p10 = pnand %p918_p9, %p912_p6 }
 0x328   :  { %v602_v62 = vpop.permute.xlu0 %601 }
 0x329   :  { %v607_v63 = vsub.f32 %v1104_v44, %v602_v62 }
 0x32b   :  { %v609_v0 = vmul.f32 1.442695, %v607_v63 }
 0x32c   :  { %v624_v2 = vpop.permute.xlu0 %623 }
 0x32d   :  { %815 = vpow2.f32 %v609_v0  ;;  %v629_v1 = vsub.f32 %v1104_v44, %v624_v2 }
 0x32f   :  { %v631_v3 = vmul.f32 1.442695, %v629_v1 }
 0x331   :  { %817 = vpow2.f32 %v631_v3 }
 0x334   :  { %v604_v4 = vpop.permute.xlu1 %603 }
 0x335   :  { %v608_v5 = vsub.f32 %v1114_v54, %v604_v4 }
 0x337   :  { %v611_v7 = vmul.f32 1.442695, %v608_v5 }
 0x338   :  { %v626_v8 = vpop.permute.xlu1 %625 }
 0x339   :  { %819 = vpow2.f32 %v611_v7  ;;  %v630_v9 = vsub.f32 %v1114_v54, %v626_v8 }
 0x33a   :  { %v816_v10 = vpop.eup %815 }
 0x33b   :  { %v633_v11 = vmul.f32 1.442695, %v630_v9  ;;  %615 = vrot.lane.b32.xlu0 %v816_v10, %s948_s22 }
 0x33d   :  { %821 = vpow2.f32 %v633_v11 }
 0x33e   :  { %v818_v12 = vpop.eup %817  ;;  %823 = vpow2.f32 %v595_v26 }
 0x33f   :  { %637 = vrot.lane.b32.xlu0 %v818_v12, %s949_s23  ;;  %825 = vpow2.f32 %v597_v28 }
 0x346   :  { %v820_v13 = vpop.eup %819 }
 0x347   :  { %617 = vrot.lane.b32.xlu1 %v820_v13, %s948_s22 }
 0x34a   :  { %v822_v14 = vpop.eup %821 }
 0x34b   :  { %639 = vrot.lane.b32.xlu1 %v822_v14, %s949_s23  ;;  %v824_v31 = vpop.eup %823 }
 0x34c   :  { %v826_v36 = vpop.eup %825 }
 0x36f   :  { %691 = vadd.xlane.f32.xlu1 %v690_v25 }
 0x3ad   :  { %v616_v30 = vpop.permute.xlu0 %615 }
 0x3ae   :  { %v621_v32 = vadd.f32 %v824_v31, %v616_v30 }
 0x3b1   :  { %v638_v33 = vpop.permute.xlu0 %637 }
 0x3b2   :  { %v643_v34 = vadd.f32 %v638_v33, %v621_v32 }
 0x3b4   :  { %827 = vlog2.f32 %v643_v34 }
 0x3b9   :  { %v618_v35 = vpop.permute.xlu1 %617 }
 0x3ba   :  { %v622_v38 = vadd.f32 %v826_v36, %v618_v35 }
 0x3bd   :  { %v640_v39 = vpop.permute.xlu1 %639 }
 0x3be   :  { %v644_v40 = vadd.f32 %v640_v39, %v622_v38 }
 0x3c0   :  { %829 = vlog2.f32 %v644_v40 }
 0x3c1   :  { %v828_v41 = vpop.eup %827 }
 0x3c2   :  { %v646_v42 = vmul.f32 0.6931472, %v828_v41 }
 0x3c4   :  { %v649_v45 = vadd.f32 %v646_v42, %v1127_v58 }
 0x3c6   :  { %v659_v47 = vsub.f32 %v657_v46, %v649_v45 }
 0x3c8   :  { %v663_v51 = vsel %vm661_vm2, %v659_v47, 0.0 }
 0x3c9   :  { %v673_v55 = vmul.f32 %v671_v22, %v663_v51 }
 0x3cb   :  { %v675_v44 = vsel %vm522_vm10, %v673_v55, 0.0 }
 0x3cd   :  { %v830_v48 = vpop.eup %829 }
 0x3ce   :  { %v648_v29 = vmul.f32 0.6931472, %v830_v48 }
 0x3d0   :  { %v650_v50 = vadd.f32 %v648_v29, %v1140_v61 }
 0x3d2   :  { %v660_v53 = vsub.f32 %v658_v52, %v650_v50 }
 0x3d4   :  { %v664_v56 = vsel %vm662_vm3, %v660_v53, 0.0 }
 0x3d5   :  { %v674_v57 = vmul.f32 %v672_v21, %v664_v56 }
 0x3d7   :  { %v676_v58 = vsel %vm522_vm10, %v674_v57, 0.0 }
 0x3d8   :  { %v677_v59 = vadd.f32 %v676_v58, %v675_v44 }
 0x3da   :  { %678 = vadd.xlane.f32.xlu0 %v677_v59 }
 0x3f8   :  { %v692_v62 = vpop.xlane.xlu1 %691 }
 0x3f9   :  { %v693_v37 = vrot.slane %v692_v62, 4 }
 0x3fb   :  { %v694_v60 = vadd.f32 %v693_v37, %v692_v62 }
 0x3fd   :  { %v695_v63 = vrot.slane %v694_v60, 2 }
 0x3ff   :  { %v696_v1 = vadd.f32 %v695_v63, %v694_v60 }
 0x401   :  { %v697_v4 = vrot.slane %v696_v1, 1 }
 0x403   :  { %v698_v8 = vadd.f32 %v697_v4, %v696_v1 }
 0x463   :  { %v679_v61 = vpop.xlane.xlu0 %678 }
 0x464   :  { %v680_v0 = vrot.slane %v679_v61, 4 }
 0x466   :  { %v681_v2 = vadd.f32 %v680_v0, %v679_v61 }
 0x468   :  { %v682_v54 = vrot.slane %v681_v2, 2 }
 0x46a   :  { %v683_v3 = vadd.f32 %v682_v54, %v681_v2 }
 0x46c   :  { %v684_v5 = vrot.slane %v683_v3, 1 }
 0x46e   :  { %v685_v7 = vadd.f32 %v684_v5, %v683_v3 }
 0x470   :  { %782 = vpush %v685_v7 }
 0x471   :  { %784 = vpush %v698_v8 }
 0x4a1   :  { %s783_s28 = spop %782 }
 0x4a2   :  { %v687_v9 = vstv %s783_s28  ;;  %s785_s29 = spop %784 }
 0x4a3   :  { %v700_v10 = vstv %s785_s29 }
 0x4a4   :  { %v702_v11 = vsel %vm701_vm4, %v687_v9, %v700_v10 }
 0x4a5   :  { %704 = vst.msk [vmem:[#allocation10] sm:$0x1] %vm703_vm5, %v702_v11 }
 0x4a6   :  { %922 = shalt.err (!%p919_p10)
}
 0x4a7   :  { %714 = dma.vmem_to_hbm [thread:$0]  %s712_s27, 16, %s1190_s7, [#allocation4]  }
 0x4a8   :  { %937 = dma.done.wait [#allocation4], 16  }
 0x4a9   :  { %938 = vsyncadd [#allocation4], 4294967280 }
 0x4aa   :  { %718 = vsyncpa [#allocation3], 1 }
 0x4ab   :  { %719 = vsyncpa [#allocation6], 1 }
 0x4ac   :  { %720 = vsyncpa [#allocation9], 1 }
 0x4ad   :  { %721 = vsyncpa [#allocation4], 1 }

</bundles_post_ra>
